<compile_context>
chip_gen: v6e
topology: v6e:2x2x1
jax: 0.10.0
libtpu: 0.0.40
codegen_flags: <defaults>
</compile_context>

<pallas_src>
import jax
import jax.numpy as jnp
from jax.experimental import pallas as pl
from jax.experimental.pallas import tpu as pltpu

# --- Hyperparameters from TextCNNBase.__init__ -------------------------------
SEQ_LEN = 3
EMB_SIZE = 2
FILTER_SIZES = (1, 2, 3)
CHANNELS = 3
TOTAL_CHANNELS = CHANNELS * len(FILTER_SIZES)           # 9
CLASS_NUM = 2

N_POS_MAX = SEQ_LEN - min(FILTER_SIZES) + 1             # 3 conv positions max
H_PAD = 16                                              # pooled channels padded to 16
CONV_COLS = N_POS_MAX * H_PAD                           # 48 fused-matmul output lanes

# Packed-parameter slab layout ([PARAM_ROWS, PARAM_COLS] f32), 8-row aligned:
#   row  0      lanes 0:9    -> conv biases in pooled order
#   rows 8:24   lanes 0:128  -> linear weight transposed, [H_PAD, 128]
#   row  24     lanes 0:128  -> linear bias, lane-padded
PARAM_ROWS, PARAM_COLS = 32, 128
B_POOL_ROW = 0
WL_ROW0 = 8
BL_ROW = WL_ROW0 + H_PAD                                # 24


# --------------------------- host-side packing -------------------------------
def _build_w_toeplitz_padded(conv_ws):
    """Block-Toeplitz conv weight [S*E, CONV_COLS], position-major columns.

    Column (position t, filter f, channel c) lives at t*H_PAD + f*C + c.
    Filters with fewer than N_POS_MAX valid positions duplicate a valid
    position for the padded t's (max-pool unaffected). Lanes 9:16 of each
    position block are zero padding.
    """
    w = jnp.zeros((SEQ_LEN * EMB_SIZE, CONV_COLS), jnp.float32)
    for f, (fs, cw) in enumerate(zip(FILTER_SIZES, conv_ws)):
        w4 = cw.reshape(CHANNELS, fs, EMB_SIZE)                  # [C, k, e]
        block = jnp.transpose(w4, (1, 2, 0)).reshape(fs * EMB_SIZE, CHANNELS)
        n_pos = SEQ_LEN - fs + 1
        for t in range(N_POS_MAX):
            te = min(t, n_pos - 1)                               # duplicate valid pos
            col0 = t * H_PAD + f * CHANNELS
            w = w.at[te * EMB_SIZE:(te + fs) * EMB_SIZE,
                     col0:col0 + CHANNELS].set(block)
    return w


def pack_fused_table(emb, conv_ws):
    """Fused embedding+conv table [S*V, CONV_COLS]:
    row s*V + v holds token v's (position s) contribution to every conv output."""
    tblk = jnp.kron(jnp.eye(SEQ_LEN, dtype=jnp.float32),
                    emb.astype(jnp.float32))                     # [S*V, S*E]
    return tblk @ _build_w_toeplitz_padded(conv_ws)              # [S*V, CONV_COLS]


def pack_params(conv_bs, wl, bl):
    """Pack conv biases + linear weight/bias into one [32, 128] f32 slab."""
    b_pool = jnp.concatenate([b.reshape(-1) for b in conv_bs])   # [9]
    p = jnp.zeros((PARAM_ROWS, PARAM_COLS), jnp.float32)
    p = p.at[B_POOL_ROW, 0:TOTAL_CHANNELS].set(b_pool)
    p = p.at[WL_ROW0:WL_ROW0 + TOTAL_CHANNELS, 0:CLASS_NUM].set(wl.T)
    p = p.at[BL_ROW, 0:CLASS_NUM].set(bl.reshape(-1))
    return p


# --------------------------------- kernel ------------------------------------
def textcnn_kernel(x_ref, t_ref, p_ref, out_ref):
    bb = x_ref.shape[0]                      # batch block
    sv = t_ref.shape[0]                      # S * V
    v = sv // SEQ_LEN

    idx = x_ref[...]                         # [bb, S] int32
    idx = jnp.clip(idx, 0, v - 1)            # guard out-of-range token ids

    # Block one-hot over all positions at once: oh[b, s*V + idx[b,s]] = 1.
    lane = jax.lax.broadcasted_iota(jnp.int32, (bb, sv), 1)
    oh = (lane == idx[:, 0:1]).astype(jnp.float32)
    for s in range(1, SEQ_LEN):
        oh = oh + (lane == idx[:, s:s + 1] + s * v).astype(jnp.float32)

    # ONE MXU call: embedding gather + every conv output (pre-bias).
    raw = jnp.dot(oh, t_ref[...], preferred_element_type=jnp.float32)  # [bb, 48]

    # MaxPool over positions: running max over N_POS_MAX blocks of H_PAD lanes.
    h = raw[:, 0:H_PAD]
    for t in range(1, N_POS_MAX):
        h = jnp.maximum(h, raw[:, t * H_PAD:(t + 1) * H_PAD])           # [bb, 16]

    # Bias + ReLU applied once after pooling (exact: bias const over t,
    # ReLU monotone). Padded lanes 9:16 stay exactly zero.
    b_pool = p_ref[B_POOL_ROW:B_POOL_ROW + 1, 0:H_PAD]                  # [1, 16]
    h = jnp.maximum(h + b_pool, 0.0)

    # Linear, lane-padded to 128 so the store is a full-lane vst.
    wl_t = p_ref[WL_ROW0:WL_ROW0 + H_PAD, :]                            # [16, 128]
    bl = p_ref[BL_ROW:BL_ROW + 1, :]                                    # [1, 128]
    logits = jnp.dot(h, wl_t, preferred_element_type=jnp.float32) + bl
    out_ref[...] = logits.astype(out_ref.dtype)


# -------------------------------- wrapper -------------------------------------
def _pick_batch_block(B):
    # Small batches: one grid step (grid overhead dominates otherwise).
    if B <= 256:
        return B
    # Large batches: big MXU-filling blocks, multiple of 8 rows.
    for bb in (256, 128, 64, 32, 16, 8):
        if B % bb == 0:
            return bb
    return B


def textcnn_forward(x, emb, conv_ws, conv_bs, wl, bl, *, batch_block=None):
    B = x.shape[0]
    tblk_conv = pack_fused_table(emb, conv_ws)        # [S*V, CONV_COLS]
    params = pack_params(conv_bs, wl, bl)             # [32, 128]

    if batch_block is None:
        batch_block = _pick_batch_block(B)
    assert B % batch_block == 0
    grid = (B // batch_block,)
    sv = tblk_conv.shape[0]

    out_pad = pl.pallas_call(
        textcnn_kernel,
        out_shape=jax.ShapeDtypeStruct((B, PARAM_COLS), jnp.float32),
        grid=grid,
        in_specs=[
            pl.BlockSpec((batch_block, SEQ_LEN), lambda i: (i, 0)),    # tokens
            pl.BlockSpec((sv, CONV_COLS), lambda i: (0, 0)),           # fused table
            pl.BlockSpec((PARAM_ROWS, PARAM_COLS), lambda i: (0, 0)),  # params
        ],
        out_specs=pl.BlockSpec((batch_block, PARAM_COLS), lambda i: (i, 0)),
        compiler_params=pltpu.CompilerParams(
            dimension_semantics=("parallel",),
            vmem_limit_bytes=32 * 1024 * 1024),
    )(x, tblk_conv, params)
    return out_pad[:, :CLASS_NUM]


# ------------------------------- reference ------------------------------------
def textcnn_reference(x, emb, conv_ws, conv_bs, wl, bl):
    """Pure-JAX reference with the original module's semantics."""
    e = emb[x]                                                    # [B, S, E]
    pooled_all = []
    for fs, w, b in zip(FILTER_SIZES, conv_ws, conv_bs):
        n_pos = SEQ_LEN - fs + 1
        outs = []
        for t in range(n_pos):
            win = e[:, t:t + fs, :].reshape(e.shape[0], fs * EMB_SIZE)
            outs.append(jnp.maximum(win @ w.T + b, 0.0))
        pooled_all.append(jnp.max(jnp.stack(outs, 1), axis=1))
    h_pool = jnp.concatenate(pooled_all, axis=1)
    return h_pool @ wl.T + bl


if __name__ == "__main__":
    B = 16
    VOCAB = 16
    key = jax.random.PRNGKey(0)
    k_x, k_emb, k_w, k_b, k_wl, k_bl = jax.random.split(key, 6)

    # Deterministic synthetic parameters (shapes follow TextCNNBase.__init__).
    x = jax.random.randint(k_x, (B, SEQ_LEN), 0, VOCAB, dtype=jnp.int32)
    emb = jax.random.normal(k_emb, (VOCAB, EMB_SIZE), jnp.float32) * 0.5

    conv_ws, conv_bs = [], []
    wkeys = jax.random.split(k_w, len(FILTER_SIZES))
    bkeys = jax.random.split(k_b, len(FILTER_SIZES))
    for fs, kw, kb in zip(FILTER_SIZES, wkeys, bkeys):
        # nn.Conv2d weight [C, 1, fs, E] flattened to [C, fs*E] (row-major (k, e)).
        conv_ws.append(jax.random.normal(kw, (CHANNELS, fs * EMB_SIZE),
                                         jnp.float32) * 0.3)
        conv_bs.append(jax.random.normal(kb, (1, CHANNELS), jnp.float32) * 0.1)

    wl = jax.random.normal(k_wl, (CLASS_NUM, TOTAL_CHANNELS), jnp.float32) * 0.3
    bl = jax.random.normal(k_bl, (1, CLASS_NUM), jnp.float32) * 0.1

    # jit the whole forward so the host-side packing (kron + .at[].set) is
    # compiled / constant-folded instead of issuing many tiny dispatches.
    forward = jax.jit(textcnn_forward, static_argnames=("batch_block",))

    out = forward(x, emb, conv_ws, conv_bs, wl, bl)
    out = jax.block_until_ready(out)

    ref = textcnn_reference(x, emb, conv_ws, conv_bs, wl, bl)
    assert out.shape == (B, CLASS_NUM)
    assert jnp.allclose(out, ref, rtol=1e-4, atol=1e-4)

    print("KERNEL_OK")
</pallas_src>

<mosaic_0001>
module attributes {stable_mosaic.version = 11 : i64} {
  func.func @textcnn_kernel(%arg0: i32, %arg1: memref<16x3xi32, #tpu.memory_space<vmem>>, %arg2: memref<48x48xf32, #tpu.memory_space<vmem>>, %arg3: memref<32x128xf32, #tpu.memory_space<vmem>>, %arg4: memref<16x128xf32, #tpu.memory_space<vmem>>) attributes {dimension_semantics = [#tpu.dimension_semantics<parallel>], iteration_bounds = array<i64: 1>, scalar_prefetch = 0 : i64, scratch_operands = 0 : i64, tpu.core_type = #tpu.core_type<tc>, window_params = [{transform_indices = @transform_0, window_bounds = array<i64: 16, 3>}, {pipeline_mode = #tpu.pipeline_mode<synchronous>, transform_indices = @transform_1, window_bounds = array<i64: 48, 48>}, {pipeline_mode = #tpu.pipeline_mode<synchronous>, transform_indices = @transform_2, window_bounds = array<i64: 32, 128>}, {transform_indices = @transform_3, window_bounds = array<i64: 16, 128>}]} {
    %c0 = arith.constant 0 : index
    %c0_0 = arith.constant 0 : index
    %0 = vector.load %arg1[%c0, %c0_0] : memref<16x3xi32, #tpu.memory_space<vmem>>, vector<16x3xi32>
    %c0_i32 = arith.constant 0 : i32
    %c15_i32 = arith.constant 15 : i32
    %1 = vector.broadcast %c0_i32 : i32 to vector<16x3xi32>
    %2 = arith.maxsi %1, %0 : vector<16x3xi32>
    %3 = vector.broadcast %c15_i32 : i32 to vector<16x3xi32>
    %4 = arith.minsi %3, %2 : vector<16x3xi32>
    %5 = tpu.iota {dimensions = array<i32: 1>} : vector<16x48xi32>
    %6 = vector.extract_strided_slice %4 {offsets = [0, 0], sizes = [16, 1], strides = [1, 1]} : vector<16x3xi32> to vector<16x1xi32>
    %7 = vector.broadcast %6 : vector<16x1xi32> to vector<16x48xi32>
    %8 = arith.cmpi eq, %5, %7 : vector<16x48xi32>
    %9 = arith.extui %8 : vector<16x48xi1> to vector<16x48xi32>
    %10 = arith.sitofp %9 : vector<16x48xi32> to vector<16x48xf32>
    %11 = vector.extract_strided_slice %4 {offsets = [0, 1], sizes = [16, 1], strides = [1, 1]} : vector<16x3xi32> to vector<16x1xi32>
    %c16_i32 = arith.constant 16 : i32
    %12 = vector.broadcast %c16_i32 : i32 to vector<16x1xi32>
    %13 = arith.addi %11, %12 : vector<16x1xi32>
    %14 = vector.broadcast %13 : vector<16x1xi32> to vector<16x48xi32>
    %15 = arith.cmpi eq, %5, %14 : vector<16x48xi32>
    %16 = arith.extui %15 : vector<16x48xi1> to vector<16x48xi32>
    %17 = arith.sitofp %16 : vector<16x48xi32> to vector<16x48xf32>
    %18 = arith.addf %10, %17 : vector<16x48xf32>
    %19 = vector.extract_strided_slice %4 {offsets = [0, 2], sizes = [16, 1], strides = [1, 1]} : vector<16x3xi32> to vector<16x1xi32>
    %c32_i32 = arith.constant 32 : i32
    %20 = vector.broadcast %c32_i32 : i32 to vector<16x1xi32>
    %21 = arith.addi %19, %20 : vector<16x1xi32>
    %22 = vector.broadcast %21 : vector<16x1xi32> to vector<16x48xi32>
    %23 = arith.cmpi eq, %5, %22 : vector<16x48xi32>
    %24 = arith.extui %23 : vector<16x48xi1> to vector<16x48xi32>
    %25 = arith.sitofp %24 : vector<16x48xi32> to vector<16x48xf32>
    %26 = arith.addf %18, %25 : vector<16x48xf32>
    %c0_1 = arith.constant 0 : index
    %c0_2 = arith.constant 0 : index
    %27 = vector.load %arg2[%c0_1, %c0_2] : memref<48x48xf32, #tpu.memory_space<vmem>>, vector<48x48xf32>
    %cst = arith.constant dense<0.000000e+00> : vector<16x48xf32>
    %28 = tpu.matmul %26, %27, %cst {dimension_numbers = #tpu.dot_dimension_numbers<[1], [0], [0], [1], [0, 0, 1, 1], [], []>} : vector<16x48xf32>, vector<48x48xf32>, vector<16x48xf32> -> vector<16x48xf32>
    %29 = vector.extract_strided_slice %28 {offsets = [0, 0], sizes = [16, 16], strides = [1, 1]} : vector<16x48xf32> to vector<16x16xf32>
    %30 = vector.extract_strided_slice %28 {offsets = [0, 16], sizes = [16, 16], strides = [1, 1]} : vector<16x48xf32> to vector<16x16xf32>
    %31 = arith.maximumf %29, %30 : vector<16x16xf32>
    %32 = vector.extract_strided_slice %28 {offsets = [0, 32], sizes = [16, 16], strides = [1, 1]} : vector<16x48xf32> to vector<16x16xf32>
    %33 = arith.maximumf %31, %32 : vector<16x16xf32>
    %c0_3 = arith.constant 0 : index
    %c0_4 = arith.constant 0 : index
    %34 = vector.load %arg3[%c0_3, %c0_4] : memref<32x128xf32, #tpu.memory_space<vmem>>, vector<1x16xf32>
    %35 = vector.broadcast %34 : vector<1x16xf32> to vector<16x16xf32>
    %36 = arith.addf %33, %35 : vector<16x16xf32>
    %cst_5 = arith.constant 0.000000e+00 : f32
    %37 = vector.broadcast %cst_5 : f32 to vector<16x16xf32>
    %38 = arith.maximumf %36, %37 : vector<16x16xf32>
    %c8 = arith.constant 8 : index
    %c0_6 = arith.constant 0 : index
    %39 = vector.load %arg3[%c8, %c0_6] : memref<32x128xf32, #tpu.memory_space<vmem>>, vector<16x128xf32>
    %c24 = arith.constant 24 : index
    %c0_7 = arith.constant 0 : index
    %40 = vector.load %arg3[%c24, %c0_7] : memref<32x128xf32, #tpu.memory_space<vmem>>, vector<1x128xf32>
    %cst_8 = arith.constant dense<0.000000e+00> : vector<16x128xf32>
    %41 = tpu.matmul %38, %39, %cst_8 {dimension_numbers = #tpu.dot_dimension_numbers<[1], [0], [0], [1], [0, 0, 1, 1], [], []>} : vector<16x16xf32>, vector<16x128xf32>, vector<16x128xf32> -> vector<16x128xf32>
    %42 = vector.broadcast %40 : vector<1x128xf32> to vector<16x128xf32>
    %43 = arith.addf %41, %42 : vector<16x128xf32>
    %c0_9 = arith.constant 0 : index
    %c0_10 = arith.constant 0 : index
    %44 = vector.load %arg4[%c0_9, %c0_10] : memref<16x128xf32, #tpu.memory_space<vmem>>, vector<16x128xf32>
    tpu.vector_store %arg4[%c0_9, %c0_10], %43 {strides = array<i32>} : memref<16x128xf32, #tpu.memory_space<vmem>>, vector<16x128xf32>,
    return
  }
  func.func @transform_0(%arg0: i32) -> (i32, i32) {
    %c0_i32 = arith.constant 0 : i32
    %c0_i32_0 = arith.constant 0 : i32
    return %arg0, %c0_i32 : i32, i32
  }
  func.func @transform_1(%arg0: i32) -> (i32, i32) {
    %c0_i32 = arith.constant 0 : i32
    %c0_i32_0 = arith.constant 0 : i32
    %c0_i32_1 = arith.constant 0 : i32
    return %c0_i32, %c0_i32_0 : i32, i32
  }
  func.func @transform_2(%arg0: i32) -> (i32, i32) {
    %c0_i32 = arith.constant 0 : i32
    %c0_i32_0 = arith.constant 0 : i32
    %c0_i32_1 = arith.constant 0 : i32
    return %c0_i32, %c0_i32_0 : i32, i32
  }
  func.func @transform_3(%arg0: i32) -> (i32, i32) {
    %c0_i32 = arith.constant 0 : i32
    %c0_i32_0 = arith.constant 0 : i32
    return %arg0, %c0_i32 : i32, i32
  }
}

</mosaic_0001>

<bundles_post_ra>
// kernel: textcnn_forward.1
= control target key start
LH: loop header
LB: loop body
LE: loop exit
PB: predicated region body
PF: predicated region fallthrough
CT: control target
= control target key end

     0   :  { %v338_v0 = vmov 0   ;;  %v339_v12 = vmov 1   ;;  %v340_v16 = vmov 2   ;;  %v24_v19 = vlaneseq  ;;  %s342_s30 = smov 112   ;;  %s343_s4 = smov 96   ;;  %s406_s0 = inlined_call_operand.vmem [shape: s32[16,3], index: 0, kind: input, shape index: {}]   ;;  %s407_s1 = inlined_call_operand.vmem [shape: f32[48,48], index: 1, kind: input, shape index: {}]   ;;  %s408_s2 = inlined_call_operand.vmem [shape: f32[32,128], index: 2, kind: input, shape index: {}]   ;;  %s409_s3 = inlined_call_operand.vmem [shape: f32[16,128], index: 3, kind: output, shape index: {}]  }
   0x1   :  { %333 = vset.pattern.permute.xlu1 %v338_v0  ;;  %332 = vset.pattern.permute.xlu0 %v338_v0  ;;  %v15_v1 = vld [vmem:[%s406_s0 + $0x8] sm:$0xff]  ;;  %v14_v2 = vld [vmem:[%s406_s0] sm:$0xff]  ;;  %v73_v11 = vld [vmem:[%s407_s1 + $0x18] sm:$0xff]  ;;  %v341_v25 = vmov 0.0   ;;  %vm76_vm10 = vcmask 392192   ;;  %vm192_vm11 = vcmask 130048  }
   0x2   :  { %vm18_vm0 = vcmp.gt.s32.totalorder %v15_v1, 0  ;;  %vm16_vm1 = vcmp.gt.s32.totalorder %v14_v2, 0  ;;  %v75_v5 = vld [vmem:[%s407_s1 + $0x28] sm:$0xff]  ;;  %v74_v8 = vld [vmem:[%s407_s1 + $0x20] sm:$0xff]  ;;  %v72_v13 = vld [vmem:[%s407_s1 + $0x10] sm:$0xff]  ;;  %v25_v22 = vand.u32 127, %v24_v19 }
   0x3   :  { %v19_v3 = vsel %vm18_vm0, %v15_v1, 0  ;;  %v17_v4 = vsel %vm16_vm1, %v14_v2, 0  ;;  %304 = vmatprep.subr.mxu0 %v75_v5  ;;  %v71_v17 = vld [vmem:[%s407_s1 + $0x8] sm:$0xff]  ;;  %v70_v18 = vld [vmem:[%s407_s1] sm:$0xff]  ;;  %v186_v38 = vld [vmem:[%s408_s2 + $0x10] sm:$0xff] }
   0x4   :  { %vm22_vm2 = vcmp.lt.s32.totalorder %v19_v3, 15  ;;  %vm20_vm3 = vcmp.lt.s32.totalorder %v17_v4, 15  ;;  %305 = vmatpush3.msra.mxu0 %v75_v5  ;;  %319 = vmatprep.subr.mxu1 %v186_v38  ;;  %v185_v39 = vld [vmem:[%s408_s2 + $0x8] sm:$0xff]  ;;  %v288_v46 = vld [vmem:[%s408_s2] ss:$0 sm:$0xff] }
   0x5   :  { %v23_v6 = vsel %vm22_vm2, %v19_v3, 15  ;;  %v21_v7 = vsel %vm20_vm3, %v17_v4, 15  ;;  %306 = vmatprep.subr.mxu0 %v74_v8  ;;  %320 = vmatpush3.msra.mxu1 %v186_v38  ;;  %v289_v55 = vld [vmem:[%s408_s2 + $0x18] ss:$0 sm:$0xff] }
   0x6   :  { %30 = vperm.xlu1 %333, %v23_v6   ;;  %27 = vperm.xlu0 %332, %v21_v7   ;;  %v39_v9 = vadd.s32 16, %v23_v6  ;;  %v38_v10 = vadd.s32 16, %v21_v7  ;;  %v54_v14 = vadd.s32 32, %v21_v7  ;;  %v55_v15 = vadd.s32 32, %v23_v6 }
   0x7   :  { %307 = vmatpush3.msra.mxu0 %v74_v8  ;;  %321 = vmatprep.subr.mxu1 %v185_v39 }
   0x8   :  { %308 = vmatprep.subr.mxu0 %v73_v11  ;;  %322 = vmatpush3.msra.mxu1 %v185_v39 }
   0x9   :  { %309 = vmatpush3.msra.mxu0 %v73_v11 }
   0xa   :  { %335 = vset.pattern.permute.xlu1 %v339_v12  ;;  %334 = vset.pattern.permute.xlu0 %v339_v12 }
   0xb   :  { %44 = vperm.xlu1 %335, %v39_v9   ;;  %41 = vperm.xlu0 %334, %v38_v10  }
   0xc   :  { %310 = vmatprep.subr.mxu0 %v72_v13 }
   0xd   :  { %311 = vmatpush3.msra.mxu0 %v72_v13 }
   0xe   :  { %312 = vmatprep.subr.mxu0 %v71_v17 }
   0xf   :  { %336 = vset.pattern.permute.xlu1 %v340_v16  ;;  %337 = vset.pattern.permute.xlu0 %v340_v16 }
  0x10   :  { %57 = vperm.xlu1 %336, %v54_v14   ;;  %60 = vperm.xlu0 %337, %v55_v15  }
  0x11   :  { %313 = vmatpush3.msra.mxu0 %v71_v17 }
  0x12   :  { %314 = vmatprep.subr.mxu0 %v70_v18 }
  0x13   :  { %315 = vmatpush3.msra.mxu0 %v70_v18 }
  0x81   :  { %v31_v20 = vpop.permute.xlu1 %30  ;;  %v28_v21 = vpop.permute.xlu0 %27 }
  0x82   :  { %vm33_vm6 = vcmp.eq.s32.totalorder %v25_v22, %v31_v20  ;;  %vm32_vm7 = vcmp.eq.s32.totalorder %v25_v22, %v28_v21 }
  0x83   :  { %v281_v28 = vsel %vm33_vm6, 1.0, %v341_v25  ;;  %v280_v29 = vsel %vm32_vm7, 1.0, %v341_v25 }
  0x86   :  { %v45_v23 = vpop.permute.xlu1 %44  ;;  %v42_v24 = vpop.permute.xlu0 %41 }
  0x87   :  { %vm47_vm4 = vcmp.eq.s32.totalorder %v25_v22, %v45_v23  ;;  %vm46_vm5 = vcmp.eq.s32.totalorder %v25_v22, %v42_v24 }
  0x88   :  { %v283_v26 = vsel %vm47_vm4, 1.0, %v341_v25  ;;  %v282_v27 = vsel %vm46_vm5, 1.0, %v341_v25 }
  0x89   :  { %v53_v32 = vadd.f32 %v283_v26, %v281_v28  ;;  %v52_v33 = vadd.f32 %v282_v27, %v280_v29 }
  0x8b   :  { %v58_v30 = vpop.permute.xlu1 %57  ;;  %v61_v31 = vpop.permute.xlu0 %60 }
  0x8c   :  { %vm62_vm8 = vcmp.eq.s32.totalorder %v25_v22, %v58_v30  ;;  %vm63_vm9 = vcmp.eq.s32.totalorder %v25_v22, %v61_v31 }
  0x8d   :  { %v284_v34 = vsel %vm62_vm8, 1.0, %v341_v25  ;;  %v285_v35 = vsel %vm63_vm9, 1.0, %v341_v25 }
  0x8e   :  { %v69_v36 = vadd.f32 %v285_v35, %v53_v32  ;;  %v68_v37 = vadd.f32 %v284_v34, %v52_v33 }
  0x90   :  { %316 = vmatprep.mubr.msk.f32.mxu0 %vm76_vm10, %v68_v37 }
  0x91   :  { %317 = vmatmul.mubr.msk.f32.vlgmr.msra.gmra.mxu0 %vm76_vm10, %v69_v36 }
 0x151   :  { %v318_v40 = vpop.f32.mrf.mxu0 }
 0x152   :  { %162 = vrot.lane.b32.xlu1 %v318_v40, %s342_s30 }
 0x153   :  { %v149_v41 = vpop.f32.mrf.mxu0 }
 0x154   :  { %168 = vrot.lane.b32.xlu0 %v149_v41, %s343_s4 }
 0x156   :  { %160 = vrot.lane.b32.xlu1 %v149_v41, %s342_s30 }
 0x15a   :  { %170 = vrot.lane.b32.xlu1 %v318_v40, %s343_s4 }
 0x1c4   :  { %v163_v42 = vpop.permute.xlu1 %162 }
 0x1c5   :  { %v167_v47 = vmax.f32 %v318_v40, %v163_v42 }
 0x1c6   :  { %v169_v45 = vpop.permute.xlu0 %168 }
 0x1c8   :  { %v161_v43 = vpop.permute.xlu1 %160 }
 0x1c9   :  { %v166_v44 = vmax.f32 %v149_v41, %v161_v43 }
 0x1cb   :  { %v174_v48 = vmax.f32 %v166_v44, %v169_v45 }
 0x1cc   :  { %v171_v49 = vpop.permute.xlu1 %170 }
 0x1cd   :  { %v175_v50 = vmax.f32 %v167_v47, %v171_v49  ;;  %v181_v51 = vadd.f32 %v288_v46, %v174_v48 }
 0x1cf   :  { %v182_v52 = vadd.f32 %v288_v46, %v175_v50  ;;  %v183_v53 = vmax.f32 %v181_v51, 0.0 }
 0x1d1   :  { %v184_v54 = vmax.f32 %v182_v52, 0.0  ;;  %323 = vmatprep.mubr.msk.f32.mxu1 %vm192_vm11, %v183_v53 }
 0x1d3   :  { %324 = vmatmul.mubr.msk.f32.vlgmr.msra.gmra.mxu1 %vm192_vm11, %v184_v54 }
 0x293   :  { %v325_v56 = vpop.f32.mrf.mxu1 }
 0x294   :  { %v271_v57 = vadd.f32 %v325_v56, %v289_v55 }
 0x295   :  { %v265_v58 = vpop.f32.mrf.mxu1 }
 0x296   :  { %275 = vst [vmem:[%s409_s3 + $0x8] sm:$0xff] %v271_v57  ;;  %v266_v59 = vadd.f32 %v289_v55, %v265_v58 }
 0x298   :  { %274 = vst [vmem:[%s409_s3] sm:$0xff] %v266_v59 }

</bundles_post_ra>
